<compile_context>
chip_gen: v6e
topology: v6e:2x2x1
jax: 0.10.0
libtpu: 0.0.40
codegen_flags: <defaults>
</compile_context>

<pallas_src>
import jax
import jax.numpy as jnp
from jax.experimental import pallas as pl
from jax.experimental.pallas import tpu as pltpu


def _round_up(x, m):
    return ((x + m - 1) // m) * m


def dqn_kernel(x_ref, w1_ref, b1_ref, wc_ref, bc_ref, wq_ref, bq_ref, out_ref):
    # fused user_fc + docs_fc (block-diagonal weight) + relu
    h1 = jnp.dot(x_ref[...], w1_ref[...], preferred_element_type=jnp.float32)
    h1 = jnp.maximum(h1 + b1_ref[...], 0.0)
    # combine_fc + relu (concat already realized by the block-diagonal layout)
    h2 = jnp.dot(h1, wc_ref[...], preferred_element_type=jnp.float32)
    h2 = jnp.maximum(h2 + bc_ref[...], 0.0)
    # q head (lane-padded to 128 columns), no activation
    out_ref[...] = (jnp.dot(h2, wq_ref[...], preferred_element_type=jnp.float32)
                    + bq_ref[...])


def init_params(key, user_dim, doc_dim, num_docs, num_actions):
    """Deterministic synthetic parameters, stored as (in, out) so forward is x @ W + b."""
    ks = jax.random.split(key, 8)

    def lin(k_w, k_b, fan_in, fan_out):
        bound = 1.0 / jnp.sqrt(fan_in)
        w = jax.random.uniform(k_w, (fan_in, fan_out), jnp.float32, -bound, bound)
        b = jax.random.uniform(k_b, (1, fan_out), jnp.float32, -bound, bound)
        return w, b

    wu, bu = lin(ks[0], ks[1], user_dim, 64)
    wd, bd = lin(ks[2], ks[3], doc_dim * num_docs, 128)
    wc, bc = lin(ks[4], ks[5], 64 + 128, 64)
    wq, bq = lin(ks[6], ks[7], 64, num_actions)
    return (wu, bu, wd, bd, wc, bc, wq, bq)


def prepare_fused_params(params, num_actions):
    """Build the kernel-side fused weights: block-diagonal first layer and a
    lane-dense (128-wide) padded q head."""
    (wu, bu, wd, bd, wc, bc, wq, bq) = params
    u_in, u_out = wu.shape
    d_in, d_out = wd.shape

    # cat([user, docs], 1) @ blockdiag(wu, wd) == cat([user @ wu, docs @ wd], 1)
    w1 = jnp.zeros((u_in + d_in, u_out + d_out), jnp.float32)
    w1 = w1.at[:u_in, :u_out].set(wu).at[u_in:, u_out:].set(wd)
    b1 = jnp.concatenate([bu, bd], axis=1)

    # pad the q head so the stored output block is a multiple of 128 lanes
    n_pad = _round_up(max(num_actions, 1), 128)
    wq_p = jnp.zeros((wq.shape[0], n_pad), jnp.float32).at[:, :num_actions].set(wq)
    bq_p = jnp.zeros((1, n_pad), jnp.float32).at[:, :num_actions].set(bq)

    return (w1, b1, wc, bc, wq_p, bq_p)


def recsim_dqn_forward(x, fused_params, num_actions):
    """x: (B, 1 + num_docs, feat) float32 -> (B, num_actions) float32."""
    B, slate, feat = x.shape
    (w1, b1, wc, bc, wq, bq) = fused_params
    feat_total = slate * feat
    assert w1.shape[0] == feat_total, "layout requires doc_dim == user_dim (shared feat axis)"
    n_pad = wq.shape[1]

    # Single contiguous input slab: [user | docs] in row order (no strided gather).
    x2 = x.reshape(B, feat_total)

    # Batch tile: multiple of 8 sublanes, capped so double-buffered tiles stay
    # far under the scoped-VMEM limit on every generation (v7x included).
    TB = min(4096, _round_up(B, 8))
    B_pad = _round_up(B, TB)
    if B_pad != B:
        x2 = jnp.pad(x2, ((0, B_pad - B), (0, 0)))

    grid = (B_pad // TB,)

    def resident(arr):
        # Full-extent block, same block index every grid step -> stays in VMEM.
        return pl.BlockSpec(arr.shape, lambda i: (0, 0))

    cost = pl.CostEstimate(
        flops=2 * B_pad * (w1.shape[0] * w1.shape[1]
                           + wc.shape[0] * wc.shape[1]
                           + wq.shape[0] * wq.shape[1]),
        transcendentals=0,
        bytes_accessed=int(B_pad * (feat_total + n_pad) * 4
                           + sum(int(a.size) * 4 for a in fused_params)),
    )

    out = pl.pallas_call(
        dqn_kernel,
        out_shape=jax.ShapeDtypeStruct((B_pad, n_pad), jnp.float32),
        grid=grid,
        in_specs=[
            pl.BlockSpec((TB, feat_total), lambda i: (i, 0)),
            resident(w1), resident(b1),
            resident(wc), resident(bc),
            resident(wq), resident(bq),
        ],
        out_specs=pl.BlockSpec((TB, n_pad), lambda i: (i, 0)),
        compiler_params=pltpu.CompilerParams(
            dimension_semantics=("parallel",),
            vmem_limit_bytes=32 * 1024 * 1024,
        ),
        cost_estimate=cost,
    )(x2, w1, b1, wc, bc, wq, bq)

    return out[:B, :num_actions]


def reference_forward(x, params):
    """Pure-JAX reference matching the PyTorch module semantics."""
    (wu, bu, wd, bd, wc, bc, wq, bq) = params
    B = x.shape[0]
    user = x[:, 0, :]
    docs = x[:, 1:, :].reshape(B, -1)
    uf = jax.nn.relu(user @ wu + bu)
    df = jax.nn.relu(docs @ wd + bd)
    h = jax.nn.relu(jnp.concatenate([uf, df], axis=1) @ wc + bc)
    return h @ wq + bq


if __name__ == "__main__":
    user_dim = 16
    doc_dim = 16          # layout (shared feat axis in x) requires doc_dim == user_dim
    num_docs = 5
    num_actions = 10
    batch = 8

    assert doc_dim == user_dim, "x layout shares the feature axis between user and docs"

    key = jax.random.PRNGKey(0)
    k_x, k_p = jax.random.split(key)

    x = jax.random.normal(k_x, (batch, 1 + num_docs, user_dim), jnp.float32)
    params = init_params(k_p, user_dim, doc_dim, num_docs, num_actions)
    fused = prepare_fused_params(params, num_actions)

    out = recsim_dqn_forward(x, fused, num_actions)
    out = jax.block_until_ready(out)

    ref = reference_forward(x, params)
    assert out.shape == (batch, num_actions)
    assert jnp.allclose(out, ref, atol=1e-5, rtol=1e-5), "mismatch vs reference"

    print("KERNEL_OK")
</pallas_src>

<mosaic_0001>
module attributes {stable_mosaic.version = 11 : i64} {
  func.func @dqn_kernel(%arg0: i32, %arg1: memref<8x96xf32, #tpu.memory_space<vmem>>, %arg2: memref<96x192xf32, #tpu.memory_space<vmem>>, %arg3: memref<1x192xf32, #tpu.memory_space<vmem>>, %arg4: memref<192x64xf32, #tpu.memory_space<vmem>>, %arg5: memref<1x64xf32, #tpu.memory_space<vmem>>, %arg6: memref<64x128xf32, #tpu.memory_space<vmem>>, %arg7: memref<1x128xf32, #tpu.memory_space<vmem>>, %arg8: memref<8x128xf32, #tpu.memory_space<vmem>>) attributes {dimension_semantics = [#tpu.dimension_semantics<parallel>], iteration_bounds = array<i64: 1>, scalar_prefetch = 0 : i64, scratch_operands = 0 : i64, tpu.core_type = #tpu.core_type<tc>, window_params = [{transform_indices = @transform_0, window_bounds = array<i64: 8, 96>}, {pipeline_mode = #tpu.pipeline_mode<synchronous>, transform_indices = @transform_1, window_bounds = array<i64: 96, 192>}, {pipeline_mode = #tpu.pipeline_mode<synchronous>, transform_indices = @transform_2, window_bounds = array<i64: 1, 192>}, {pipeline_mode = #tpu.pipeline_mode<synchronous>, transform_indices = @transform_3, window_bounds = array<i64: 192, 64>}, {pipeline_mode = #tpu.pipeline_mode<synchronous>, transform_indices = @transform_4, window_bounds = array<i64: 1, 64>}, {pipeline_mode = #tpu.pipeline_mode<synchronous>, transform_indices = @transform_5, window_bounds = array<i64: 64, 128>}, {pipeline_mode = #tpu.pipeline_mode<synchronous>, transform_indices = @transform_6, window_bounds = array<i64: 1, 128>}, {transform_indices = @transform_7, window_bounds = array<i64: 8, 128>}]} {
    %c0 = arith.constant 0 : index
    %c0_0 = arith.constant 0 : index
    %0 = vector.load %arg1[%c0, %c0_0] : memref<8x96xf32, #tpu.memory_space<vmem>>, vector<8x96xf32>
    %c0_1 = arith.constant 0 : index
    %c0_2 = arith.constant 0 : index
    %1 = vector.load %arg2[%c0_1, %c0_2] : memref<96x192xf32, #tpu.memory_space<vmem>>, vector<96x192xf32>
    %cst = arith.constant dense<0.000000e+00> : vector<8x192xf32>
    %2 = tpu.matmul %0, %1, %cst {dimension_numbers = #tpu.dot_dimension_numbers<[1], [0], [0], [1], [0, 0, 1, 1], [], []>} : vector<8x96xf32>, vector<96x192xf32>, vector<8x192xf32> -> vector<8x192xf32>
    %c0_3 = arith.constant 0 : index
    %c0_4 = arith.constant 0 : index
    %3 = vector.load %arg3[%c0_3, %c0_4] : memref<1x192xf32, #tpu.memory_space<vmem>>, vector<1x192xf32>
    %4 = vector.broadcast %3 : vector<1x192xf32> to vector<8x192xf32>
    %5 = arith.addf %2, %4 : vector<8x192xf32>
    %cst_5 = arith.constant 0.000000e+00 : f32
    %6 = vector.broadcast %cst_5 : f32 to vector<8x192xf32>
    %7 = arith.maximumf %5, %6 : vector<8x192xf32>
    %c0_6 = arith.constant 0 : index
    %c0_7 = arith.constant 0 : index
    %8 = vector.load %arg4[%c0_6, %c0_7] : memref<192x64xf32, #tpu.memory_space<vmem>>, vector<192x64xf32>
    %cst_8 = arith.constant dense<0.000000e+00> : vector<8x64xf32>
    %9 = tpu.matmul %7, %8, %cst_8 {dimension_numbers = #tpu.dot_dimension_numbers<[1], [0], [0], [1], [0, 0, 1, 1], [], []>} : vector<8x192xf32>, vector<192x64xf32>, vector<8x64xf32> -> vector<8x64xf32>
    %c0_9 = arith.constant 0 : index
    %c0_10 = arith.constant 0 : index
    %10 = vector.load %arg5[%c0_9, %c0_10] : memref<1x64xf32, #tpu.memory_space<vmem>>, vector<1x64xf32>
    %11 = vector.broadcast %10 : vector<1x64xf32> to vector<8x64xf32>
    %12 = arith.addf %9, %11 : vector<8x64xf32>
    %cst_11 = arith.constant 0.000000e+00 : f32
    %13 = vector.broadcast %cst_11 : f32 to vector<8x64xf32>
    %14 = arith.maximumf %12, %13 : vector<8x64xf32>
    %c0_12 = arith.constant 0 : index
    %c0_13 = arith.constant 0 : index
    %15 = vector.load %arg6[%c0_12, %c0_13] : memref<64x128xf32, #tpu.memory_space<vmem>>, vector<64x128xf32>
    %cst_14 = arith.constant dense<0.000000e+00> : vector<8x128xf32>
    %16 = tpu.matmul %14, %15, %cst_14 {dimension_numbers = #tpu.dot_dimension_numbers<[1], [0], [0], [1], [0, 0, 1, 1], [], []>} : vector<8x64xf32>, vector<64x128xf32>, vector<8x128xf32> -> vector<8x128xf32>
    %c0_15 = arith.constant 0 : index
    %c0_16 = arith.constant 0 : index
    %17 = vector.load %arg7[%c0_15, %c0_16] : memref<1x128xf32, #tpu.memory_space<vmem>>, vector<1x128xf32>
    %18 = vector.broadcast %17 : vector<1x128xf32> to vector<8x128xf32>
    %19 = arith.addf %16, %18 : vector<8x128xf32>
    %c0_17 = arith.constant 0 : index
    %c0_18 = arith.constant 0 : index
    %20 = vector.load %arg8[%c0_17, %c0_18] : memref<8x128xf32, #tpu.memory_space<vmem>>, vector<8x128xf32>
    tpu.vector_store %arg8[%c0_17, %c0_18], %19 {strides = array<i32>} : memref<8x128xf32, #tpu.memory_space<vmem>>, vector<8x128xf32>,
    return
  }
  func.func @transform_0(%arg0: i32) -> (i32, i32) {
    %c0_i32 = arith.constant 0 : i32
    %c0_i32_0 = arith.constant 0 : i32
    return %arg0, %c0_i32 : i32, i32
  }
  func.func @transform_1(%arg0: i32) -> (i32, i32) {
    %c0_i32 = arith.constant 0 : i32
    %c0_i32_0 = arith.constant 0 : i32
    %c0_i32_1 = arith.constant 0 : i32
    return %c0_i32, %c0_i32_0 : i32, i32
  }
  func.func @transform_2(%arg0: i32) -> (i32, i32) {
    %c0_i32 = arith.constant 0 : i32
    %c0_i32_0 = arith.constant 0 : i32
    %c0_i32_1 = arith.constant 0 : i32
    return %c0_i32, %c0_i32_0 : i32, i32
  }
  func.func @transform_3(%arg0: i32) -> (i32, i32) {
    %c0_i32 = arith.constant 0 : i32
    %c0_i32_0 = arith.constant 0 : i32
    %c0_i32_1 = arith.constant 0 : i32
    return %c0_i32, %c0_i32_0 : i32, i32
  }
  func.func @transform_4(%arg0: i32) -> (i32, i32) {
    %c0_i32 = arith.constant 0 : i32
    %c0_i32_0 = arith.constant 0 : i32
    %c0_i32_1 = arith.constant 0 : i32
    return %c0_i32, %c0_i32_0 : i32, i32
  }
  func.func @transform_5(%arg0: i32) -> (i32, i32) {
    %c0_i32 = arith.constant 0 : i32
    %c0_i32_0 = arith.constant 0 : i32
    %c0_i32_1 = arith.constant 0 : i32
    return %c0_i32, %c0_i32_0 : i32, i32
  }
  func.func @transform_6(%arg0: i32) -> (i32, i32) {
    %c0_i32 = arith.constant 0 : i32
    %c0_i32_0 = arith.constant 0 : i32
    %c0_i32_1 = arith.constant 0 : i32
    return %c0_i32, %c0_i32_0 : i32, i32
  }
  func.func @transform_7(%arg0: i32) -> (i32, i32) {
    %c0_i32 = arith.constant 0 : i32
    %c0_i32_0 = arith.constant 0 : i32
    return %arg0, %c0_i32 : i32, i32
  }
}

</mosaic_0001>

<bundles_post_ra>
// kernel: tpu_custom_call.1
= control target key start
LH: loop header
LB: loop body
LE: loop exit
PB: predicated region body
PF: predicated region fallthrough
CT: control target
= control target key end

     0   :  { %v408_v4 = vmov 0.0   ;;  %s670_s0 = inlined_call_operand.vmem [shape: f32[8,96], index: 0, kind: input, shape index: {}]   ;;  %s671_s1 = inlined_call_operand.vmem [shape: f32[96,192], index: 1, kind: input, shape index: {}]   ;;  %s672_s2 = inlined_call_operand.vmem [shape: f32[1,192], index: 2, kind: input, shape index: {}]   ;;  %s673_s3 = inlined_call_operand.vmem [shape: f32[192,64], index: 3, kind: input, shape index: {}]   ;;  %s674_s4 = inlined_call_operand.vmem [shape: f32[1,64], index: 4, kind: input, shape index: {}]   ;;  %s675_s5 = inlined_call_operand.vmem [shape: f32[64,128], index: 5, kind: input, shape index: {}]   ;;  %s676_s6 = inlined_call_operand.vmem [shape: f32[1,128], index: 6, kind: input, shape index: {}]   ;;  %s677_s7 = inlined_call_operand.hbm [shape: f32[8,128], index: 7, kind: output, shape index: {}]  }
   0x1   :  { %v51_v0 = vld [vmem:[%s671_s1 + $0xb8] sm:$0xff]  ;;  %v50_v1 = vld [vmem:[%s671_s1 + $0xb0] sm:$0xff]  ;;  %v49_v2 = vld [vmem:[%s671_s1 + $0xa8] sm:$0xff]  ;;  %132 = vmatprep.mubr.f32.mxu0 %v408_v4  ;;  %176 = vmatprep.subr.mxu1 %v408_v4 }
   0x2   :  { %76 = vmatprep.subr.mxu0 %v51_v0  ;;  %v48_v3 = vld [vmem:[%s671_s1 + $0xa0] sm:$0xff]  ;;  %v47_v5 = vld [vmem:[%s671_s1 + $0x98] sm:$0xff]  ;;  %v46_v6 = vld [vmem:[%s671_s1 + $0x90] sm:$0xff] }
   0x3   :  { %77 = vmatpush1.msra.mxu0 %v50_v1  ;;  %v45_v7 = vld [vmem:[%s671_s1 + $0x88] sm:$0xff]  ;;  %v44_v8 = vld [vmem:[%s671_s1 + $0x80] sm:$0xff]  ;;  %v43_v9 = vld [vmem:[%s671_s1 + $0x78] sm:$0xff] }
   0x4   :  { %78 = vmatprep.subr.mxu0 %v49_v2  ;;  %v42_v10 = vld [vmem:[%s671_s1 + $0x70] sm:$0xff]  ;;  %v41_v11 = vld [vmem:[%s671_s1 + $0x68] sm:$0xff]  ;;  %v156_v12 = vld [vmem:[%s673_s3 + $0x78] sm:$0xff] }
   0x5   :  { %79 = vmatpush1.msra.mxu0 %v48_v3  ;;  %v155_v13 = vld [vmem:[%s673_s3 + $0x70] sm:$0xff]  ;;  %v40_v14 = vld [vmem:[%s671_s1 + $0x60] sm:$0xff]  ;;  %177 = vmatpush1.msra.mxu1 %v156_v12  ;;  %v39_v15 = vld [vmem:[%s671_s1 + $0x58] sm:$0xff] }
   0x6   :  { %80 = vmatprep.subr.mxu0 %v47_v5  ;;  %178 = vmatprep.subr.mxu1 %v408_v4  ;;  %v154_v16 = vld [vmem:[%s673_s3 + $0x68] sm:$0xff]  ;;  %v38_v17 = vld [vmem:[%s671_s1 + $0x50] sm:$0xff]  ;;  %v153_v19 = vld [vmem:[%s673_s3 + $0x60] sm:$0xff] }
   0x7   :  { %81 = vmatpush1.msra.mxu0 %v46_v6  ;;  %179 = vmatpush1.msra.mxu1 %v155_v13  ;;  %v37_v18 = vld [vmem:[%s671_s1 + $0x48] sm:$0xff]  ;;  %v36_v20 = vld [vmem:[%s671_s1 + $0x40] sm:$0xff]  ;;  %v35_v21 = vld [vmem:[%s671_s1 + $0x38] sm:$0xff] }
   0x8   :  { %82 = vmatprep.subr.mxu0 %v45_v7  ;;  %180 = vmatprep.subr.mxu1 %v408_v4  ;;  %v152_v22 = vld [vmem:[%s673_s3 + $0x58] sm:$0xff]  ;;  %v34_v23 = vld [vmem:[%s671_s1 + $0x30] sm:$0xff] }
   0x9   :  { %83 = vmatpush1.msra.mxu0 %v44_v8  ;;  %181 = vmatpush1.msra.mxu1 %v154_v16 }
   0xa   :  { %84 = vmatprep.subr.mxu0 %v43_v9  ;;  %182 = vmatprep.subr.mxu1 %v408_v4 }
   0xb   :  { %85 = vmatpush1.msra.mxu0 %v42_v10  ;;  %183 = vmatpush1.msra.mxu1 %v153_v19 }
   0xc   :  { %86 = vmatprep.subr.mxu0 %v41_v11 }
   0xd   :  { %87 = vmatpush1.msra.mxu0 %v40_v14 }
   0xe   :  { %88 = vmatprep.subr.mxu0 %v39_v15 }
   0xf   :  { %89 = vmatpush1.msra.mxu0 %v38_v17 }
  0x10   :  { %90 = vmatprep.subr.mxu0 %v37_v18 }
  0x11   :  { %12 = vsyncpa [#allocation3], 0  ;;  %91 = vmatpush1.msra.mxu0 %v36_v20  ;;  %v33_v24 = vld [vmem:[%s671_s1 + $0x28] sm:$0xff]  ;;  %184 = vmatprep.subr.mxu1 %v408_v4  ;;  %v151_v25 = vld [vmem:[%s673_s3 + $0x50] sm:$0xff]  ;;  %vm64_vm0 = vcmask 785408   ;;  %v54_v55 = vlaneseq  ;;  %vm172_vm1 = vcmask 523264  }
  0x12   :  { %92 = vmatprep.subr.mxu0 %v35_v21  ;;  %v32_v26 = vld [vmem:[%s671_s1 + $0x20] sm:$0xff]  ;;  %185 = vmatpush1.msra.mxu1 %v152_v22  ;;  %v31_v27 = vld [vmem:[%s671_s1 + $0x18] sm:$0xff]  ;;  %v150_v28 = vld [vmem:[%s673_s3 + $0x48] sm:$0xff]  ;;  %vm409_vm2 = vmmov 0   ;;  %s410_s23 = smov [#allocation2]  }
  0x13   :  { %93 = vmatpush1.msra.mxu0 %v34_v23  ;;  %186 = vmatprep.subr.mxu1 %v408_v4  ;;  %v30_v29 = vld [vmem:[%s671_s1 + $0x10] sm:$0xff]  ;;  %v29_v30 = vld [vmem:[%s671_s1 + $0x8] sm:$0xff]  ;;  %v149_v31 = vld [vmem:[%s673_s3 + $0x40] sm:$0xff]  ;;  %v55_v56 = vshrl.u32 %v54_v55, 7 }
  0x14   :  { %94 = vmatprep.subr.mxu0 %v33_v24  ;;  %187 = vmatpush1.msra.mxu1 %v151_v25  ;;  %v28_v32 = vld [vmem:[%s671_s1] sm:$0xff]  ;;  %v148_v34 = vld [vmem:[%s673_s3 + $0x38] sm:$0xff]  ;;  %v147_v35 = vld [vmem:[%s673_s3 + $0x30] sm:$0xff] }
  0x15   :  { %95 = vmatpush1.msra.mxu0 %v32_v26  ;;  %188 = vmatprep.subr.mxu1 %v408_v4  ;;  %v27_v33 = vld [vmem:[%s670_s0] sm:$0xff]  ;;  %v146_v36 = vld [vmem:[%s673_s3 + $0x28] sm:$0xff]  ;;  %v144_v38 = vld [vmem:[%s673_s3 + $0x18] sm:$0xff]  ;;  %v56_v57 = vsub.s32 0, %v55_v56  ;;  %v60_v59 = vsub.s32 1, %v55_v56 }
  0x16   :  { %96 = vmatprep.subr.mxu0 %v31_v27  ;;  %189 = vmatpush1.msra.mxu1 %v150_v28  ;;  %v145_v37 = vld [vmem:[%s673_s3 + $0x20] sm:$0xff]  ;;  %v143_v39 = vld [vmem:[%s673_s3 + $0x10] sm:$0xff]  ;;  %v142_v40 = vld [vmem:[%s673_s3 + $0x8] sm:$0xff] }
  0x17   :  { %97 = vmatpush1.msra.mxu0 %v30_v29  ;;  %190 = vmatprep.subr.mxu1 %v408_v4  ;;  %v141_v41 = vld [vmem:[%s673_s3] sm:$0xff]  ;;  %v164_v42 = vld [vmem:[%s673_s3 + $0xb8] sm:$0xff]  ;;  %v163_v43 = vld [vmem:[%s673_s3 + $0xb0] sm:$0xff] }
  0x18   :  { %98 = vmatprep.subr.mxu0 %v29_v30  ;;  %191 = vmatpush1.msra.mxu1 %v149_v31  ;;  %v162_v44 = vld [vmem:[%s673_s3 + $0xa8] sm:$0xff]  ;;  %v161_v45 = vld [vmem:[%s673_s3 + $0xa0] sm:$0xff]  ;;  %v160_v46 = vld [vmem:[%s673_s3 + $0x98] sm:$0xff] }
  0x19   :  { %99 = vmatpush1.msra.mxu0 %v28_v32  ;;  %192 = vmatprep.subr.mxu1 %v408_v4  ;;  %v159_v47 = vld [vmem:[%s673_s3 + $0x90] sm:$0xff]  ;;  %v158_v48 = vld [vmem:[%s673_s3 + $0x88] sm:$0xff]  ;;  %v157_v49 = vld [vmem:[%s673_s3 + $0x80] sm:$0xff] }
  0x1a   :  { %350 = vmatmul.mubr.msk.f32.vlgmr.msra.gmra.mxu0 %vm64_vm0, %v27_v33  ;;  %193 = vmatpush1.msra.mxu1 %v148_v34  ;;  %v254_v50 = vld [vmem:[%s675_s5 + $0x38] sm:$0xff]  ;;  %v253_v51 = vld [vmem:[%s675_s5 + $0x30] sm:$0xff]  ;;  %v252_v52 = vld [vmem:[%s675_s5 + $0x28] sm:$0xff] }
  0x1b   :  { %194 = vmatprep.subr.mxu1 %v408_v4  ;;  %364 = vmatprep.subr.mxu0 %v408_v4  ;;  %v251_v53 = vld [vmem:[%s675_s5 + $0x20] sm:$0xff]  ;;  %v250_v54 = vld [vmem:[%s675_s5 + $0x18] sm:$0xff]  ;;  %v249_v5 = vld [vmem:[%s675_s5 + $0x10] sm:$0xff] }
  0x1c   :  { %195 = vmatpush1.msra.mxu1 %v147_v35  ;;  %365 = vmatpush3.msra.mxu0 %v254_v50  ;;  %v52_v58 = vld [vmem:[%s672_s2] sm:$0x3]  ;;  %v248_v6 = vld [vmem:[%s675_s5 + $0x8] sm:$0xff] }
  0x1d   :  { %196 = vmatprep.subr.mxu1 %v408_v4  ;;  %366 = vmatprep.subr.mxu0 %v408_v4  ;;  %v57_v60 = vrot.slane %v52_v58, %v56_v57  ;;  %v61_v61 = vrot.slane %v52_v58, %v60_v59  ;;  %v247_v7 = vld [vmem:[%s675_s5] sm:$0xff]  ;;  %s342_s5 = sshll.u32 %s410_s23, 4  ;;  %s343_s5 = int_to_ptr.vmem [resolvable:$true] %s342_s5 }
  0x1e   :  { %197 = vmatpush1.msra.mxu1 %v146_v36  ;;  %367 = vmatpush3.msra.mxu0 %v253_v51  ;;  %v351_v8 = vld [vmem:[%s674_s4] ss:$0 sm:$0xff]  ;;  %s386_s1 = scalar_lea.vmem %s343_s5, 128  ;;  %p391_p1 = scmp.lt.s32.totalorder %s343_s5, %s343_s5 }
  0x1f   :  { %198 = vmatprep.subr.mxu1 %v408_v4  ;;  %368 = vmatprep.subr.mxu0 %v408_v4  ;;  %v353_v13 = vld [vmem:[%s676_s6] ss:$0 sm:$0xff]  ;;  %p387_p0 = scmp.ne.s32.totalorder %s343_s5, %s386_s1  ;;  %p392_p2 = scmp.lt.s32.totalorder %s386_s1, %s386_s1 }
  0x20   :  { %199 = vmatpush1.msra.mxu1 %v145_v37  ;;  %369 = vmatpush3.msra.mxu0 %v252_v52 }
  0x21   :  { %200 = vmatprep.subr.mxu1 %v408_v4  ;;  %370 = vmatprep.subr.mxu0 %v408_v4  ;;  %p393_p3 = por %p392_p2, %p391_p1 }
  0x22   :  { %201 = vmatpush1.msra.mxu1 %v144_v38  ;;  %371 = vmatpush3.msra.mxu0 %v251_v53 }
  0x23   :  { %202 = vmatprep.subr.mxu1 %v408_v4  ;;  %372 = vmatprep.subr.mxu0 %v408_v4  ;;  %p394_p4 = pnand %p393_p3, %p387_p0 }
  0x24   :  { %203 = vmatpush1.msra.mxu1 %v143_v39  ;;  %373 = vmatpush3.msra.mxu0 %v250_v54 }
  0x25   :  { %204 = vmatprep.subr.mxu1 %v408_v4  ;;  %374 = vmatprep.subr.mxu0 %v408_v4 }
  0x26   :  { %205 = vmatpush1.msra.mxu1 %v142_v40  ;;  %375 = vmatpush3.msra.mxu0 %v249_v5 }
  0x27   :  { %206 = vmatprep.subr.mxu1 %v408_v4  ;;  %376 = vmatprep.subr.mxu0 %v408_v4 }
  0x28   :  { %207 = vmatpush1.msra.mxu1 %v141_v41  ;;  %377 = vmatpush3.msra.mxu0 %v248_v6 }
  0x29   :  { %224 = vmatprep.subr.mxu1 %v408_v4  ;;  %378 = vmatprep.subr.mxu0 %v408_v4 }
  0x2a   :  { %225 = vmatpush2.msra.mxu1 %v164_v42  ;;  %379 = vmatpush3.msra.mxu0 %v247_v7 }
  0x2b   :  { %226 = vmatprep.subr.mxu1 %v408_v4  ;;  %380 = vmatprep.mubr.msk.f32.mxu0 %vm409_vm2, %v408_v4 }
  0x2c   :  { %227 = vmatpush2.msra.mxu1 %v163_v43 }
  0x2d   :  { %228 = vmatprep.subr.mxu1 %v408_v4 }
  0x2e   :  { %229 = vmatpush2.msra.mxu1 %v162_v44 }
  0x2f   :  { %230 = vmatprep.subr.mxu1 %v408_v4 }
  0x30   :  { %231 = vmatpush2.msra.mxu1 %v161_v45 }
  0x31   :  { %232 = vmatprep.subr.mxu1 %v408_v4 }
  0x32   :  { %233 = vmatpush2.msra.mxu1 %v160_v46 }
  0x33   :  { %234 = vmatprep.subr.mxu1 %v408_v4 }
  0x34   :  { %235 = vmatpush2.msra.mxu1 %v159_v47 }
  0x35   :  { %236 = vmatprep.subr.mxu1 %v408_v4 }
  0x36   :  { %237 = vmatpush2.msra.mxu1 %v158_v48 }
  0x37   :  { %238 = vmatprep.subr.mxu1 %v408_v4 }
  0x38   :  { %239 = vmatpush2.msra.mxu1 %v157_v49 }
  0xda   :  { %v134_v62 = vpop.f32.mrf.mxu0 }
  0xdb   :  { %v135_v63 = vadd.f32 %v134_v62, %v57_v60 }
  0xdc   :  { %v136_v0 = vpop.f32.mrf.mxu0 }
  0xdd   :  { %v137_v1 = vadd.f32 %v136_v0, %v61_v61  ;;  %v139_v3 = vmax.f32 %v135_v63, 0.0 }
  0xdf   :  { %v140_v2 = vmax.f32 %v137_v1, 0.0 }
  0xe1   :  { %352 = vmatprep.mubr.msk.f32.mxu1 %vm172_vm1, %v140_v2 }
  0xe2   :  { %241 = vmatmul.mubr.f32.vlgmr.msra.gmra.mxu1 %v139_v3 }
 0x1a2   :  { %v242_v9 = vpop.f32.mrf.mxu1 }
 0x1a3   :  { %v243_v10 = vadd.f32 %v351_v8, %v242_v9 }
 0x1a4   :  { %v244_v11 = vpop.f32.mrf.mxu1 }
 0x1a5   :  { %v246_v12 = vmax.f32 %v243_v10, 0.0 }
 0x1a7   :  { %381 = vmatmul.mubr.msk.f32.vlgmr.msra.gmra.mxu0 %vm172_vm1, %v246_v12 }
 0x267   :  { %v331_v14 = vpop.f32.mrf.mxu0 }
 0x268   :  { %v332_v15 = vadd.f32 %v353_v13, %v331_v14 }
 0x269   :  { %v382_v4 = vpop.f32.mrf.mxu0 }
 0x26a   :  { %335 = vst [vmem:[#allocation2] sm:$0xff] %v332_v15 }
 0x26b   :  { %397 = shalt.err (!%p394_p4)
}
 0x26c   :  { %345 = dma.vmem_to_hbm [thread:$0]  %s343_s5, 128, %s677_s7, [#allocation3]  }
 0x26d   :  { %406 = dma.done.wait [#allocation3], 128  }
 0x26e   :  { %407 = vsyncadd [#allocation3], 4294967168 }
 0x26f   :  { %349 = vsyncpa [#allocation3], 1 }

</bundles_post_ra>
